<compile_context>
chip_gen: v5e
topology: v5e:2x2
jax: 0.10.0
libtpu: 0.0.40
codegen_flags: <defaults>
</compile_context>

<pallas_src>
import functools

import jax
import jax.numpy as jnp
from jax.experimental import pallas as pl
from jax.experimental.pallas import tpu as pltpu


# --------------------------------------------------------------------------- kernels
def _classifier_kernel_single_k(x_ref, w_ref, b_ref, o_ref):
    # dropout(p=0.0) and activation=None (module defaults) are identities.
    # Whole K fits in one tile: write the result directly (no accumulator passes).
    o_ref[...] = (
        jnp.dot(x_ref[...], w_ref[...], preferred_element_type=jnp.float32)
        + b_ref[...]
    ).astype(o_ref.dtype)


def _classifier_kernel(x_ref, w_ref, b_ref, o_ref, acc_ref):
    # K is tiled: f32 VMEM accumulator, K-innermost ("arbitrary") axis,
    # bias added once in the epilogue.
    k = pl.program_id(2)

    @pl.when(k == 0)
    def _init():
        acc_ref[...] = jnp.zeros_like(acc_ref)

    # x block: [tm, tk]; w block: [tk, tn] (pre-transposed in the wrapper) ->
    # canonical MXU contraction, no in-loop relayout.
    acc_ref[...] += jnp.dot(x_ref[...], w_ref[...], preferred_element_type=jnp.float32)

    @pl.when(k == pl.num_programs(2) - 1)
    def _finalize():
        o_ref[...] = (acc_ref[...] + b_ref[...]).astype(o_ref.dtype)


# --------------------------------------------------------------------------- helpers
def _round_up(v, m):
    return ((v + m - 1) // m) * m


def _tpu_limits():
    """VMEM capacity (bytes) and TensorCores per chip, with safe fallbacks."""
    vmem_cap = 128 * 1024 * 1024
    try:
        vmem_cap = int(pltpu.get_tpu_info().vmem_capacity_bytes)
    except Exception:
        pass
    try:
        kind = jax.devices()[0].device_kind.lower()
    except Exception:
        kind = ""
    # v7x: 64 MiB VMEM per TensorCore and 2 TensorCores per chip.
    num_cores = 2 if ("v7" in kind or vmem_cap <= 64 * 1024 * 1024) else 1
    return vmem_cap, num_cores


def _best_tile(dim, candidates, align):
    """Pick the candidate tile minimizing padding overshoot; ties -> largest tile."""
    dim_a = _round_up(dim, align)
    best = None
    for c in candidates:
        if c > dim_a:
            continue
        pad = _round_up(dim, c) - dim
        if best is None or pad < best[0] or (pad == best[0] and c > best[1]):
            best = (pad, c)
    return best[1] if best is not None else dim_a


def _choose_tiles(B, N, K, in_itemsize, out_itemsize, vmem_cap, num_cores):
    # f32 sublane packing = 8.
    # TODO(synk): make M rounding dtype-aware (16 for bf16, 32 for int8/fp8) before
    # feeding sub-32-bit inputs directly.
    budget = int(vmem_cap * (0.65 if vmem_cap <= 64 * 1024 * 1024 else 0.70))

    # M: sublane axis.
    tm = _round_up(B, 8) if B <= 512 else _best_tile(B, (512, 384, 256, 128), 8)
    # N: lane axis.  Full dim when small; otherwise prefer 256-multiples (v6e/v7x MXU
    # is 2x256x256) that minimize padding overshoot.
    tn = _round_up(N, 128) if N <= 1024 else _best_tile(N, (1024, 768, 512, 256), 128)
    # K: contraction axis.  Keep >= 512 when tiled (v5e: amortize the acc RMW traffic).
    tk = _round_up(K, 128) if K <= 1024 else _best_tile(K, (1024, 768, 512), 128)

    def footprint(tm_, tn_, tk_):
        fb = 2 * (tm_ * tk_ + tk_ * tn_) * in_itemsize        # double-buffered x / w
        fb += 2 * tm_ * tn_ * out_itemsize + 2 * tn_ * 4      # out tiles + bias strips
        if _round_up(K, tk_) // tk_ > 1:
            fb += tm_ * tn_ * 4                                # f32 accumulator scratch
        return fb

    while footprint(tm, tn, tk) > budget:
        if tk > 512:
            tk = max(512, _round_up(tk // 2, 128))
        elif tn > 256:
            tn = max(256, _round_up(tn // 2, 128))
        elif tm > 64:
            tm = max(8, _round_up(tm // 2, 8))
        elif tk > 128:
            tk = max(128, _round_up(tk // 2, 128))
        else:
            break

    # v7x: 2 TensorCores are sharded over the 'parallel' grid axes -- make sure there
    # are at least num_cores output tiles (split N without adding padding if possible).
    if num_cores > 1:
        Mp, Np = _round_up(B, tm), _round_up(N, tn)
        if (Mp // tm) * (Np // tn) < num_cores:
            for cand in range(tn - 128, 127, -128):
                if Np % cand == 0 and (Mp // tm) * (Np // cand) >= num_cores:
                    tn = cand
                    break
    return tm, tn, tk


# --------------------------------------------------------------------------- wrapper
@functools.partial(
    jax.jit, static_argnames=("tm", "tn", "tk", "vmem_limit", "compute_dtype"))
def _classifier_forward_impl(x, weight, bias, *, tm, tn, tk, vmem_limit, compute_dtype):
    B, K = x.shape
    N = weight.shape[0]
    Mp, Np, Kp = _round_up(B, tm), _round_up(N, tn), _round_up(K, tk)

    # TODO(synk): dropout with p>0 in training mode would need pltpu.prng_* masking.

    # One-time weight transpose to [K, N]; folded into the pad below when padding is
    # needed.  K MUST stay zero-padded so the accumulation is exact; M/N pad rows/cols
    # are sliced off at the end.  Padding/slicing are skipped when shapes already align.
    w_t = weight.T
    x_p = x if (Mp == B and Kp == K) else jnp.pad(x, ((0, Mp - B), (0, Kp - K)))
    w_p = w_t if (Kp == K and Np == N) else jnp.pad(w_t, ((0, Kp - K), (0, Np - N)))
    b_p = (bias if Np == N else jnp.pad(bias, (0, Np - N))).reshape(1, Np)

    if compute_dtype is not None:
        # Optional low-precision compute (e.g. bf16-in / f32-acc): higher MXU rate and
        # half the x/w HBM traffic.  Numerics change -- off by default.
        x_p = x_p.astype(compute_dtype)
        w_p = w_p.astype(compute_dtype)

    k_steps = Kp // tk
    flops = 2 * Mp * Np * Kp
    bytes_accessed = (x_p.size * x_p.dtype.itemsize
                      + w_p.size * w_p.dtype.itemsize
                      + b_p.size * b_p.dtype.itemsize
                      + Mp * Np * x.dtype.itemsize)

    if k_steps == 1:
        grid = (Mp // tm, Np // tn)
        kernel = _classifier_kernel_single_k
        in_specs = [
            pl.BlockSpec((tm, tk), lambda i, j: (i, 0)),   # activations
            pl.BlockSpec((tk, tn), lambda i, j: (0, j)),   # weight [K, N]
            pl.BlockSpec((1, tn), lambda i, j: (0, j)),    # bias strip
        ]
        out_specs = pl.BlockSpec((tm, tn), lambda i, j: (i, j))
        scratch_shapes = []
        dim_sem = ("parallel", "parallel")
    else:
        grid = (Mp // tm, Np // tn, k_steps)
        kernel = _classifier_kernel
        in_specs = [
            pl.BlockSpec((tm, tk), lambda i, j, k: (i, k)),
            pl.BlockSpec((tk, tn), lambda i, j, k: (k, j)),
            pl.BlockSpec((1, tn), lambda i, j, k: (0, j)),
        ]
        out_specs = pl.BlockSpec((tm, tn), lambda i, j, k: (i, j))
        scratch_shapes = [pltpu.VMEM((tm, tn), jnp.float32)]
        dim_sem = ("parallel", "parallel", "arbitrary")

    out_p = pl.pallas_call(
        kernel,
        out_shape=jax.ShapeDtypeStruct((Mp, Np), x.dtype),
        grid_spec=pltpu.PrefetchScalarGridSpec(
            num_scalar_prefetch=0,
            grid=grid,
            in_specs=in_specs,
            out_specs=out_specs,
            scratch_shapes=scratch_shapes,
        ),
        compiler_params=pltpu.CompilerParams(
            dimension_semantics=dim_sem,
            vmem_limit_bytes=vmem_limit,
        ),
        cost_estimate=pl.CostEstimate(
            flops=flops, transcendentals=0, bytes_accessed=bytes_accessed),
    )(x_p, w_p, b_p)

    return out_p if (Mp == B and Np == N) else out_p[:B, :N]


def classifier_forward(x, weight, bias, *, tm=None, tn=None, tk=None, compute_dtype=None):
    """Classifier.forward: dropout(p=0) -> x @ W^T + b -> activation(None).

    x: [B, K], weight: [N, K] (PyTorch nn.Linear layout), bias: [N] -> [B, N].
    """
    B, K = x.shape
    N, K2 = weight.shape
    assert K == K2 and bias.shape == (N,)

    vmem_cap, num_cores = _tpu_limits()
    if tm is None or tn is None or tk is None:
        in_isz = (jnp.dtype(compute_dtype).itemsize if compute_dtype is not None
                  else x.dtype.itemsize)
        a_tm, a_tn, a_tk = _choose_tiles(B, N, K, in_isz, x.dtype.itemsize,
                                         vmem_cap, num_cores)
        tm = a_tm if tm is None else tm
        tn = a_tn if tn is None else tn
        tk = a_tk if tk is None else tk

    vmem_limit = int(vmem_cap * 0.75)   # 48 MiB on v7x, 96 MiB on v5e/v6e
    return _classifier_forward_impl(
        x, weight, bias, tm=int(tm), tn=int(tn), tk=int(tk),
        vmem_limit=vmem_limit, compute_dtype=compute_dtype)


# --------------------------------------------------------------------------- demo
if __name__ == "__main__":
    key = jax.random.PRNGKey(0)
    kx, kw, kb = jax.random.split(key, 3)

    batch, input_size, output_size = 8, 256, 384

    x = jax.random.normal(kx, (batch, input_size), dtype=jnp.float32)
    # Deterministic init mimicking nn.Linear's uniform(-1/sqrt(in), 1/sqrt(in)).
    bound = 1.0 / (input_size ** 0.5)
    weight = jax.random.uniform(kw, (output_size, input_size),
                                minval=-bound, maxval=bound, dtype=jnp.float32)
    bias = jax.random.uniform(kb, (output_size,),
                              minval=-bound, maxval=bound, dtype=jnp.float32)

    ref = x @ weight.T + bias

    # Auto tiles: single-K fast path (no accumulator), generation-aware sizing,
    # N split across TensorCores on v7x.
    out_auto = classifier_forward(x, weight, bias)
    jax.block_until_ready(out_auto)
    assert out_auto.shape == (batch, output_size)
    assert jnp.allclose(out_auto, ref, atol=1e-4, rtol=1e-4)

    # Explicit small tiles: exercises the multi-step (M, N, K) grid, the f32
    # accumulator K loop and the bias epilogue.
    out_tiled = classifier_forward(x, weight, bias, tm=8, tn=128, tk=128)
    jax.block_until_ready(out_tiled)
    assert out_tiled.shape == (batch, output_size)
    assert jnp.allclose(out_tiled, ref, atol=1e-4, rtol=1e-4)

    print("KERNEL_OK")
</pallas_src>

<mosaic_0001>
module attributes {stable_mosaic.version = 11 : i64} {
  func.func @_classifier_kernel_single_k(%arg0: i32, %arg1: i32, %arg2: memref<8x256xf32, #tpu.memory_space<vmem>>, %arg3: memref<256x384xf32, #tpu.memory_space<vmem>>, %arg4: memref<1x384xf32, #tpu.memory_space<vmem>>, %arg5: memref<8x384xf32, #tpu.memory_space<vmem>>) attributes {dimension_semantics = [#tpu.dimension_semantics<parallel>, #tpu.dimension_semantics<parallel>], iteration_bounds = array<i64: 1, 1>, scalar_prefetch = 0 : i64, scratch_operands = 0 : i64, tpu.core_type = #tpu.core_type<tc>, window_params = [{transform_indices = @transform_0, window_bounds = array<i64: 8, 256>}, {transform_indices = @transform_1, window_bounds = array<i64: 256, 384>}, {transform_indices = @transform_2, window_bounds = array<i64: 1, 384>}, {transform_indices = @transform_3, window_bounds = array<i64: 8, 384>}]} {
    %c0 = arith.constant 0 : index
    %c0_0 = arith.constant 0 : index
    %0 = vector.load %arg2[%c0, %c0_0] : memref<8x256xf32, #tpu.memory_space<vmem>>, vector<8x256xf32>
    %c0_1 = arith.constant 0 : index
    %c0_2 = arith.constant 0 : index
    %1 = vector.load %arg3[%c0_1, %c0_2] : memref<256x384xf32, #tpu.memory_space<vmem>>, vector<256x384xf32>
    %cst = arith.constant dense<0.000000e+00> : vector<8x384xf32>
    %2 = tpu.matmul %0, %1, %cst {dimension_numbers = #tpu.dot_dimension_numbers<[1], [0], [0], [1], [0, 0, 1, 1], [], []>} : vector<8x256xf32>, vector<256x384xf32>, vector<8x384xf32> -> vector<8x384xf32>
    %c0_3 = arith.constant 0 : index
    %c0_4 = arith.constant 0 : index
    %3 = vector.load %arg4[%c0_3, %c0_4] : memref<1x384xf32, #tpu.memory_space<vmem>>, vector<1x384xf32>
    %4 = vector.broadcast %3 : vector<1x384xf32> to vector<8x384xf32>
    %5 = arith.addf %2, %4 : vector<8x384xf32>
    %c0_5 = arith.constant 0 : index
    %c0_6 = arith.constant 0 : index
    %6 = vector.load %arg5[%c0_5, %c0_6] : memref<8x384xf32, #tpu.memory_space<vmem>>, vector<8x384xf32>
    tpu.vector_store %arg5[%c0_5, %c0_6], %5 {strides = array<i32>} : memref<8x384xf32, #tpu.memory_space<vmem>>, vector<8x384xf32>,
    return
  }
  func.func @transform_0(%arg0: i32, %arg1: i32) -> (i32, i32) {
    %c0_i32 = arith.constant 0 : i32
    %c0_i32_0 = arith.constant 0 : i32
    return %arg0, %c0_i32 : i32, i32
  }
  func.func @transform_1(%arg0: i32, %arg1: i32) -> (i32, i32) {
    %c0_i32 = arith.constant 0 : i32
    %c0_i32_0 = arith.constant 0 : i32
    return %c0_i32, %arg1 : i32, i32
  }
  func.func @transform_2(%arg0: i32, %arg1: i32) -> (i32, i32) {
    %c0_i32 = arith.constant 0 : i32
    %c0_i32_0 = arith.constant 0 : i32
    return %c0_i32, %arg1 : i32, i32
  }
  func.func @transform_3(%arg0: i32, %arg1: i32) -> (i32, i32) {
    %c0_i32 = arith.constant 0 : i32
    return %arg0, %arg1 : i32, i32
  }
}

</mosaic_0001>

<bundles_post_ra>
// kernel: _classifier_forward_impl.1
= control target key start
LH: loop header
LB: loop body
LE: loop exit
PB: predicated region body
PF: predicated region fallthrough
CT: control target
= control target key end

     0   :  { %s613_s0 = inlined_call_operand.vmem [shape: f32[8,256], index: 0, kind: input, shape index: {}]   ;;  %s614_s1 = inlined_call_operand.vmem [shape: f32[256,384], index: 1, kind: input, shape index: {}]   ;;  %s615_s2 = inlined_call_operand.vmem [shape: f32[1,384], index: 2, kind: input, shape index: {}]   ;;  %s616_s3 = inlined_call_operand.hbm [shape: f32[8,384], index: 3, kind: output, shape index: {}]  }
   0x1   :  { %v62_v0 = vld [vmem:[%s614_s1 + $0x168] sm:$0xff]  ;;  %v59_v1 = vld [vmem:[%s614_s1 + $0x150] sm:$0xff]  ;;  %v56_v4 = vld [vmem:[%s614_s1 + $0x138] sm:$0xff] }
   0x2   :  { %v110_v2 = vld [vmem:[%s614_s1 + $0x2e8] sm:$0xff]  ;;  %121 = vmatpush.msra.mxu0 %v62_v0  ;;  %v107_v3 = vld [vmem:[%s614_s1 + $0x2d0] sm:$0xff]  ;;  %v104_v5 = vld [vmem:[%s614_s1 + $0x2b8] sm:$0xff] }
   0x3   :  { %141 = vmatpush.msra.mxu1 %v110_v2  ;;  %v53_v6 = vld [vmem:[%s614_s1 + $0x120] sm:$0xff]  ;;  %v50_v8 = vld [vmem:[%s614_s1 + $0x108] sm:$0xff]  ;;  %v47_v10 = vld [vmem:[%s614_s1 + $0xf0] sm:$0xff] }
   0x4   :  { %122 = vmatpush.msra.mxu0 %v59_v1  ;;  %v101_v7 = vld [vmem:[%s614_s1 + $0x2a0] sm:$0xff]  ;;  %v98_v9 = vld [vmem:[%s614_s1 + $0x288] sm:$0xff]  ;;  %v95_v11 = vld [vmem:[%s614_s1 + $0x270] sm:$0xff] }
   0x5   :  { %142 = vmatpush.msra.mxu1 %v107_v3  ;;  %v63_v12 = vld [vmem:[%s614_s1 + $0x170] sm:$0xff]  ;;  %v60_v13 = vld [vmem:[%s614_s1 + $0x158] sm:$0xff]  ;;  %v57_v17 = vld [vmem:[%s614_s1 + $0x140] sm:$0xff] }
   0x6   :  { %123 = vmatpush.msra.mxu0 %v56_v4  ;;  %v111_v14 = vld [vmem:[%s614_s1 + $0x2f0] sm:$0xff]  ;;  %v44_v15 = vld [vmem:[%s614_s1 + $0xd8] sm:$0xff]  ;;  %161 = vmatpush.msra.mxu2 %v63_v12  ;;  %v41_v19 = vld [vmem:[%s614_s1 + $0xc0] sm:$0xff] }
   0x7   :  { %143 = vmatpush.msra.mxu1 %v104_v5  ;;  %v92_v16 = vld [vmem:[%s614_s1 + $0x258] sm:$0xff]  ;;  %181 = vmatpush.msra.mxu3 %v111_v14  ;;  %v89_v20 = vld [vmem:[%s614_s1 + $0x240] sm:$0xff]  ;;  %v54_v22 = vld [vmem:[%s614_s1 + $0x128] sm:$0xff] }
   0x8   :  { %124 = vmatpush.msra.mxu0 %v53_v6  ;;  %v108_v18 = vld [vmem:[%s614_s1 + $0x2d8] sm:$0xff]  ;;  %162 = vmatpush.msra.mxu2 %v60_v13  ;;  %v105_v21 = vld [vmem:[%s614_s1 + $0x2c0] sm:$0xff]  ;;  %v102_v23 = vld [vmem:[%s614_s1 + $0x2a8] sm:$0xff] }
   0x9   :  { %144 = vmatpush.msra.mxu1 %v101_v7  ;;  %182 = vmatpush.msra.mxu3 %v108_v18  ;;  %v38_v24 = vld [vmem:[%s614_s1 + $0xa8] sm:$0xff]  ;;  %v51_v26 = vld [vmem:[%s614_s1 + $0x110] sm:$0xff]  ;;  %v48_v30 = vld [vmem:[%s614_s1 + $0xf8] sm:$0xff] }
   0xa   :  { %125 = vmatpush.msra.mxu0 %v50_v8  ;;  %v86_v25 = vld [vmem:[%s614_s1 + $0x228] sm:$0xff]  ;;  %163 = vmatpush.msra.mxu2 %v57_v17  ;;  %v99_v27 = vld [vmem:[%s614_s1 + $0x290] sm:$0xff]  ;;  %v96_v31 = vld [vmem:[%s614_s1 + $0x278] sm:$0xff] }
   0xb   :  { %145 = vmatpush.msra.mxu1 %v98_v9  ;;  %183 = vmatpush.msra.mxu3 %v105_v21  ;;  %v35_v28 = vld [vmem:[%s614_s1 + $0x90] sm:$0xff]  ;;  %v32_v32 = vld [vmem:[%s614_s1 + $0x78] sm:$0xff]  ;;  %v45_v34 = vld [vmem:[%s614_s1 + $0xe0] sm:$0xff] }
   0xc   :  { %126 = vmatpush.msra.mxu0 %v47_v10  ;;  %v83_v29 = vld [vmem:[%s614_s1 + $0x210] sm:$0xff]  ;;  %164 = vmatpush.msra.mxu2 %v54_v22  ;;  %v80_v33 = vld [vmem:[%s614_s1 + $0x1f8] sm:$0xff]  ;;  %v93_v35 = vld [vmem:[%s614_s1 + $0x260] sm:$0xff] }
   0xd   :  { %146 = vmatpush.msra.mxu1 %v95_v11  ;;  %184 = vmatpush.msra.mxu3 %v102_v23  ;;  %v29_v36 = vld [vmem:[%s614_s1 + $0x60] sm:$0xff]  ;;  %v42_v38 = vld [vmem:[%s614_s1 + $0xc8] sm:$0xff]  ;;  %v39_v42 = vld [vmem:[%s614_s1 + $0xb0] sm:$0xff] }
   0xe   :  { %127 = vmatpush.msra.mxu0 %v44_v15  ;;  %165 = vmatpush.msra.mxu2 %v51_v26  ;;  %v77_v37 = vld [vmem:[%s614_s1 + $0x1e0] sm:$0xff]  ;;  %v90_v39 = vld [vmem:[%s614_s1 + $0x248] sm:$0xff]  ;;  %v87_v43 = vld [vmem:[%s614_s1 + $0x230] sm:$0xff] }
   0xf   :  { %147 = vmatpush.msra.mxu1 %v92_v16  ;;  %185 = vmatpush.msra.mxu3 %v99_v27  ;;  %v26_v40 = vld [vmem:[%s614_s1 + $0x48] sm:$0xff]  ;;  %v23_v44 = vld [vmem:[%s614_s1 + $0x30] sm:$0xff]  ;;  %v36_v46 = vld [vmem:[%s614_s1 + $0x98] sm:$0xff] }
  0x10   :  { %128 = vmatpush.msra.mxu0 %v41_v19  ;;  %166 = vmatpush.msra.mxu2 %v48_v30  ;;  %v74_v41 = vld [vmem:[%s614_s1 + $0x1c8] sm:$0xff]  ;;  %v71_v45 = vld [vmem:[%s614_s1 + $0x1b0] sm:$0xff]  ;;  %v84_v47 = vld [vmem:[%s614_s1 + $0x218] sm:$0xff] }
  0x11   :  { %148 = vmatpush.msra.mxu1 %v89_v20  ;;  %186 = vmatpush.msra.mxu3 %v96_v31  ;;  %v20_v48 = vld [vmem:[%s614_s1 + $0x18] sm:$0xff]  ;;  %v33_v50 = vld [vmem:[%s614_s1 + $0x80] sm:$0xff]  ;;  %v30_v56 = vld [vmem:[%s614_s1 + $0x68] sm:$0xff] }
  0x12   :  { %129 = vmatpush.msra.mxu0 %v38_v24  ;;  %167 = vmatpush.msra.mxu2 %v45_v34  ;;  %v68_v49 = vld [vmem:[%s614_s1 + $0x198] sm:$0xff]  ;;  %v81_v51 = vld [vmem:[%s614_s1 + $0x200] sm:$0xff]  ;;  %v78_v57 = vld [vmem:[%s614_s1 + $0x1e8] sm:$0xff] }
  0x13   :  { %149 = vmatpush.msra.mxu1 %v86_v25  ;;  %187 = vmatpush.msra.mxu3 %v93_v35  ;;  %v17_v52 = vld [vmem:[%s614_s1] sm:$0xff]  ;;  %v64_v54 = vld [vmem:[%s614_s1 + $0x178] sm:$0xff]  ;;  %v27_v60 = vld [vmem:[%s614_s1 + $0x50] sm:$0xff] }
  0x14   :  { %130 = vmatpush.msra.mxu0 %v35_v28  ;;  %168 = vmatpush.msra.mxu2 %v42_v38  ;;  %v65_v53 = vld [vmem:[%s614_s1 + $0x180] sm:$0xff]  ;;  %v112_v55 = vld [vmem:[%s614_s1 + $0x2f8] sm:$0xff]  ;;  %v75_v61 = vld [vmem:[%s614_s1 + $0x1d0] sm:$0xff] }
  0x15   :  { %150 = vmatpush.msra.mxu1 %v83_v29  ;;  %188 = vmatpush.msra.mxu3 %v90_v39  ;;  %v61_v58 = vld [vmem:[%s614_s1 + $0x160] sm:$0xff]  ;;  %v58_v62 = vld [vmem:[%s614_s1 + $0x148] sm:$0xff] }
  0x16   :  { %131 = vmatpush.msra.mxu0 %v32_v32  ;;  %169 = vmatpush.msra.mxu2 %v39_v42  ;;  %v109_v59 = vld [vmem:[%s614_s1 + $0x2e0] sm:$0xff]  ;;  %v106_v63 = vld [vmem:[%s614_s1 + $0x2c8] sm:$0xff] }
  0x17   :  { %151 = vmatpush.msra.mxu1 %v80_v33  ;;  %189 = vmatpush.msra.mxu3 %v87_v43 }
  0x18   :  { %132 = vmatpush.msra.mxu0 %v29_v36  ;;  %170 = vmatpush.msra.mxu2 %v36_v46 }
  0x19   :  { %152 = vmatpush.msra.mxu1 %v77_v37  ;;  %190 = vmatpush.msra.mxu3 %v84_v47 }
  0x1a   :  { %133 = vmatpush.msra.mxu0 %v26_v40  ;;  %171 = vmatpush.msra.mxu2 %v33_v50 }
  0x1b   :  { %153 = vmatpush.msra.mxu1 %v74_v41  ;;  %191 = vmatpush.msra.mxu3 %v81_v51 }
  0x1c   :  { %134 = vmatpush.msra.mxu0 %v23_v44  ;;  %172 = vmatpush.msra.mxu2 %v30_v56 }
  0x1d   :  { %154 = vmatpush.msra.mxu1 %v71_v45  ;;  %192 = vmatpush.msra.mxu3 %v78_v57 }
  0x1e   :  { %135 = vmatpush.msra.mxu0 %v20_v48 }
  0x1f   :  { %155 = vmatpush.msra.mxu1 %v68_v49 }
  0x20   :  { %136 = vmatpush.msra.mxu0 %v17_v52 }
  0x21   :  { %156 = vmatpush.msra.mxu1 %v65_v53 }
  0x22   :  { %201 = vmatpush.msrb.mxu0 %v64_v54 }
  0x23   :  { %221 = vmatpush.msrb.mxu1 %v112_v55 }
  0x24   :  { %8 = vsyncpa [#allocation3], 0  ;;  %202 = vmatpush.msrb.mxu0 %v61_v58  ;;  %v24_v0 = vld [vmem:[%s614_s1 + $0x38] sm:$0xff]  ;;  %v55_v2 = vld [vmem:[%s614_s1 + $0x130] sm:$0xff]  ;;  %173 = vmatpush.msra.mxu2 %v27_v60 }
  0x25   :  { %222 = vmatpush.msrb.mxu1 %v109_v59  ;;  %v72_v1 = vld [vmem:[%s614_s1 + $0x1b8] sm:$0xff]  ;;  %v103_v3 = vld [vmem:[%s614_s1 + $0x2b0] sm:$0xff]  ;;  %193 = vmatpush.msra.mxu3 %v75_v61  ;;  %v21_v4 = vld [vmem:[%s614_s1 + $0x20] sm:$0xff] }
  0x26   :  { %203 = vmatpush.msrb.mxu0 %v58_v62  ;;  %v518_v5 = vld [vmem:[%s613_s0] sm:$0xff]  ;;  %v52_v6 = vld [vmem:[%s614_s1 + $0x118] sm:$0xff]  ;;  %174 = vmatpush.msra.mxu2 %v24_v0  ;;  %v18_v8 = vld [vmem:[%s614_s1 + $0x8] sm:$0xff] }
  0x27   :  { %223 = vmatpush.msrb.mxu1 %v106_v63  ;;  %v100_v7 = vld [vmem:[%s614_s1 + $0x298] sm:$0xff]  ;;  %194 = vmatpush.msra.mxu3 %v72_v1  ;;  %v69_v9 = vld [vmem:[%s614_s1 + $0x1a0] sm:$0xff]  ;;  %v16_v12 = vld [vmem:[%s613_s0 + $0x8] sm:$0xff] }
  0x28   :  { %204 = vmatpush.msrb.mxu0 %v55_v2  ;;  %v49_v10 = vld [vmem:[%s614_s1 + $0x100] sm:$0xff]  ;;  %175 = vmatpush.msra.mxu2 %v21_v4  ;;  %v46_v13 = vld [vmem:[%s614_s1 + $0xe8] sm:$0xff]  ;;  %v43_v16 = vld [vmem:[%s614_s1 + $0xd0] sm:$0xff] }
  0x29   :  { %224 = vmatpush.msrb.mxu1 %v103_v3  ;;  %v97_v11 = vld [vmem:[%s614_s1 + $0x280] sm:$0xff]  ;;  %137 = vmatmul.f32.vlgmr.msra.gmra.mxu0 %v518_v5  ;;  %v94_v14 = vld [vmem:[%s614_s1 + $0x268] sm:$0xff]  ;;  %v91_v17 = vld [vmem:[%s614_s1 + $0x250] sm:$0xff] }
  0x2a   :  { %205 = vmatpush.msrb.mxu0 %v52_v6  ;;  %176 = vmatpush.msra.mxu2 %v18_v8  ;;  %v66_v15 = vld [vmem:[%s614_s1 + $0x188] sm:$0xff]  ;;  %v40_v18 = vld [vmem:[%s614_s1 + $0xb8] sm:$0xff]  ;;  %v37_v20 = vld [vmem:[%s614_s1 + $0xa0] sm:$0xff] }
  0x2b   :  { %225 = vmatpush.msrb.mxu1 %v100_v7  ;;  %195 = vmatpush.msra.mxu3 %v69_v9  ;;  %v88_v19 = vld [vmem:[%s614_s1 + $0x238] sm:$0xff]  ;;  %v85_v21 = vld [vmem:[%s614_s1 + $0x220] sm:$0xff]  ;;  %v34_v22 = vld [vmem:[%s614_s1 + $0x88] sm:$0xff] }
  0x2c   :  { %206 = vmatpush.msrb.mxu0 %v49_v10  ;;  %157 = vmatmul.f32.vlgmr.msra.gmra.mxu1 %v16_v12  ;;  %v82_v23 = vld [vmem:[%s614_s1 + $0x208] sm:$0xff]  ;;  %v31_v24 = vld [vmem:[%s614_s1 + $0x70] sm:$0xff]  ;;  %v28_v26 = vld [vmem:[%s614_s1 + $0x58] sm:$0xff] }
  0x2d   :  { %226 = vmatpush.msrb.mxu1 %v97_v11  ;;  %177 = vmatmul.f32.vlgmr.msra.gmra.mxu2 %v518_v5  ;;  %v79_v25 = vld [vmem:[%s614_s1 + $0x1f0] sm:$0xff]  ;;  %v76_v27 = vld [vmem:[%s614_s1 + $0x1d8] sm:$0xff]  ;;  %v25_v28 = vld [vmem:[%s614_s1 + $0x40] sm:$0xff] }
  0x2e   :  { %207 = vmatpush.msrb.mxu0 %v46_v13  ;;  %196 = vmatpush.msra.mxu3 %v66_v15  ;;  %v73_v29 = vld [vmem:[%s614_s1 + $0x1c0] sm:$0xff]  ;;  %v22_v30 = vld [vmem:[%s614_s1 + $0x28] sm:$0xff]  ;;  %v19_v32 = vld [vmem:[%s614_s1 + $0x10] sm:$0xff] }
  0x2f   :  { %227 = vmatpush.msrb.mxu1 %v94_v14  ;;  %197 = vmatmul.f32.vlgmr.msra.gmra.mxu3 %v16_v12  ;;  %v70_v31 = vld [vmem:[%s614_s1 + $0x1a8] sm:$0xff]  ;;  %v67_v33 = vld [vmem:[%s614_s1 + $0x190] sm:$0xff]  ;;  %v113_v34 = vld [vmem:[%s615_s2] sm:$0x7]  ;;  %s287_s1 = smov [#allocation2]   ;;  %s251_s2 = sshll.u32 %s616_s3, 4  ;;  %s252_s2 = int_to_ptr.hbm [resolvable:$true] %s251_s2 }
  0x30   :  { %208 = vmatpush.msrb.mxu0 %v43_v16  ;;  %v115_v35 = vperm.slane %v113_v34, 0  ;;  %v116_v40 = vperm.slane %v113_v34, 1  ;;  %v117_v45 = vperm.slane %v113_v34, 2  ;;  %s249_s19 = sshll.u32 %s287_s1, 4  ;;  %s250_s19 = int_to_ptr.vmem [resolvable:$true] %s249_s19 }
  0x31   :  { %228 = vmatpush.msrb.mxu1 %v91_v17 }
  0x32   :  { %209 = vmatpush.msrb.mxu0 %v40_v18 }
  0x33   :  { %229 = vmatpush.msrb.mxu1 %v88_v19 }
  0x34   :  { %210 = vmatpush.msrb.mxu0 %v37_v20 }
  0x35   :  { %230 = vmatpush.msrb.mxu1 %v85_v21 }
  0x36   :  { %211 = vmatpush.msrb.mxu0 %v34_v22 }
  0x37   :  { %231 = vmatpush.msrb.mxu1 %v82_v23 }
  0x38   :  { %212 = vmatpush.msrb.mxu0 %v31_v24 }
  0x39   :  { %232 = vmatpush.msrb.mxu1 %v79_v25 }
  0x3a   :  { %213 = vmatpush.msrb.mxu0 %v28_v26 }
  0x3b   :  { %233 = vmatpush.msrb.mxu1 %v76_v27 }
  0x3c   :  { %214 = vmatpush.msrb.mxu0 %v25_v28 }
  0x3d   :  { %234 = vmatpush.msrb.mxu1 %v73_v29 }
  0x3e   :  { %215 = vmatpush.msrb.mxu0 %v22_v30 }
  0x3f   :  { %235 = vmatpush.msrb.mxu1 %v70_v31 }
  0x40   :  { %216 = vmatpush.msrb.mxu0 %v19_v32 }
  0x41   :  { %236 = vmatpush.msrb.mxu1 %v67_v33  ;;  %217 = vmatmul.f32.vlgmr.msrb.gmra.mxu0 %v518_v5 }
  0x42   :  { %237 = vmatmul.f32.vlgmr.msrb.gmra.mxu1 %v16_v12 }
  0xa6   :  { %v138_v36 = vpop.f32.mrf.mxu0 }
  0xa7   :  { %v139_v37 = vadd.f32 %v138_v36, %v115_v35 }
  0xa9   :  { %v158_v38 = vpop.f32.mrf.mxu1 }
  0xaa   :  { %v159_v39 = vadd.f32 %v158_v38, %v139_v37 }
  0xac   :  { %241 = vst [vmem:[#allocation2] sm:$0xff] %v159_v39 }
  0xb0   :  { %v178_v41 = vpop.f32.mrf.mxu2 }
  0xb1   :  { %v179_v42 = vadd.f32 %v178_v41, %v116_v40 }
  0xb2   :  { %v198_v43 = vpop.f32.mrf.mxu3 }
  0xb3   :  { %v199_v44 = vadd.f32 %v198_v43, %v179_v42 }
  0xb5   :  { %242 = vst [vmem:[#allocation2 + $0x8] sm:$0xff] %v199_v44 }
  0xbe   :  { %v218_v46 = vpop.f32.mrf.mxu0 }
  0xbf   :  { %v238_v47 = vpop.f32.mrf.mxu1  ;;  %v219_v48 = vadd.f32 %v218_v46, %v117_v45 }
  0xc1   :  { %v239_v49 = vadd.f32 %v238_v47, %v219_v48 }
  0xc3   :  { %243 = vst [vmem:[#allocation2 + $0x10] sm:$0xff] %v239_v49 }
  0xc4   :  { %254 = dma.vmem_to_hbm [thread:$0]  %s250_s19, 384, %s252_s2, [#allocation3]  }
  0xc5   :  { %285 = dma.done.wait [#allocation3], 384  }
  0xc6   :  { %286 = vsyncadd [#allocation3], 4294966912 }
  0xc7   :  { %259 = vsyncpa [#allocation3], 1 }

</bundles_post_ra>
